<compile_context>
chip_gen: v7x
topology: tpu7x:2x2x1
jax: 0.10.0
libtpu: 0.0.40
codegen_flags: <defaults>
</compile_context>

<pallas_src>
import jax
import jax.numpy as jnp
from jax.experimental import pallas as pl
from jax.experimental.pallas import tpu as pltpu

_LANE = 128
# Per-buffer budget for the last_hidden_state tile (Pallas double-buffers it).
_HID_TILE_BUDGET_BYTES = 12 * 1024 * 1024


def _head_kernel(hid_ref, mask_ref, w_ref, b_ref, out_ref, acc_ref, cnt_ref):
    # hid_ref : [TB, TS, H]  last hidden states tile (native dtype, e.g. bf16)
    # mask_ref: [TB, TS]     attention mask tile (0/1, any int/float dtype)
    # w_ref   : [H, NPAD]    fc weight, transposed and lane-padded to 128
    # b_ref   : [1, NPAD]    fc bias, lane-padded
    # out_ref : [TB, NPAD]   padded output (resident across the S grid axis)
    # acc_ref : [TB, NPAD]   f32 scratch: sum_s (mask * hid) @ W
    # cnt_ref : [TB, 1]      f32 scratch: sum_s mask
    s = pl.program_id(1)

    @pl.when(s == 0)
    def _():
        acc_ref[...] = jnp.zeros_like(acc_ref)
        cnt_ref[...] = jnp.zeros_like(cnt_ref)

    # Cast only the in-VMEM tile to f32 (f32 accumulation; v5e has no bf16 VPU).
    hid = hid_ref[...].astype(jnp.float32)        # [TB, TS, H]
    mask = mask_ref[...].astype(jnp.float32)      # [TB, TS]

    masked = hid * mask[:, :, None]               # [TB, TS, H]  (VPU)
    sum_emb = jnp.sum(masked, axis=1)             # [TB, H]      (sublane reduce)

    # Project this tile's contribution straight onto the (padded) fc weight on
    # the MXU and accumulate in a small [TB, 128] f32 accumulator.
    acc_ref[...] += jnp.dot(sum_emb, w_ref[...],
                            preferred_element_type=jnp.float32)
    cnt_ref[...] += jnp.sum(mask, axis=1, keepdims=True)

    @pl.when(s == pl.num_programs(1) - 1)
    def _():
        denom = jnp.maximum(cnt_ref[...], 1e-9)   # torch.clamp(min=1e-9)
        out_ref[...] = (acc_ref[...] / denom + b_ref[...]).astype(out_ref.dtype)


def _pick_block_s(S, tb, H, itemsize):
    """Largest multiple-of-128 seq tile that divides S and fits the budget."""
    if S <= 128:
        return S
    for cand in (2048, 1024, 512, 256, 128):
        if (cand <= S and S % cand == 0
                and tb * cand * H * itemsize <= _HID_TILE_BUDGET_BYTES):
            return cand
    return S  # fallback: single S step (odd sequence length)


def custom_model_head(last_hidden_state, attention_mask, fc_weight, fc_bias,
                      *, block_b=None, block_s=None):
    """last_hidden_state: [B, S, H] (any float dtype, passed through natively);
    attention_mask: [B, S]; fc_weight: [6, H]; fc_bias: [6]  ->  [B, 6] f32."""
    B, S, H = last_hidden_state.shape
    n_out = fc_weight.shape[0]
    n_pad = ((n_out + _LANE - 1) // _LANE) * _LANE

    tb = block_b if block_b is not None else (8 if B % 8 == 0 else B)
    if B % tb != 0:
        tb = B
    itemsize = jnp.dtype(last_hidden_state.dtype).itemsize
    if block_s is not None and S % block_s == 0:
        ts = block_s
    else:
        ts = _pick_block_s(S, tb, H, itemsize)

    grid = (B // tb, S // ts)

    # Tiny weight/bias, prepared once, lane-padded so the output is lane-dense.
    w_pad = jnp.zeros((H, n_pad), jnp.float32).at[:, :n_out].set(
        fc_weight.T.astype(jnp.float32))
    b_pad = jnp.zeros((1, n_pad), jnp.float32).at[0, :n_out].set(
        fc_bias.astype(jnp.float32))

    out_padded = pl.pallas_call(
        _head_kernel,
        out_shape=jax.ShapeDtypeStruct((B, n_pad), jnp.float32),
        grid_spec=pltpu.PrefetchScalarGridSpec(
            num_scalar_prefetch=0,
            grid=grid,
            in_specs=[
                pl.BlockSpec((tb, ts, H), lambda b, s: (b, s, 0)),
                pl.BlockSpec((tb, ts), lambda b, s: (b, s)),
                pl.BlockSpec((H, n_pad), lambda b, s: (0, 0)),
                pl.BlockSpec((1, n_pad), lambda b, s: (0, 0)),
            ],
            out_specs=pl.BlockSpec((tb, n_pad), lambda b, s: (b, 0)),
            scratch_shapes=[
                pltpu.VMEM((tb, n_pad), jnp.float32),
                pltpu.VMEM((tb, 1), jnp.float32),
            ],
        ),
        compiler_params=pltpu.CompilerParams(
            dimension_semantics=("parallel", "arbitrary"),
            vmem_limit_bytes=48 * 1024 * 1024,
        ),
    )(last_hidden_state, attention_mask, w_pad, b_pad)

    return out_padded[:, :n_out]


def reference_head(last_hidden_state, attention_mask, fc_weight, fc_bias):
    """Pure-JAX reference mirroring the PyTorch forward."""
    hid = last_hidden_state.astype(jnp.float32)
    m = attention_mask.astype(jnp.float32)[:, :, None]
    sum_emb = jnp.sum(hid * m, axis=1)
    sum_mask = jnp.maximum(jnp.sum(m, axis=1), 1e-9)  # torch.clamp(min=1e-9)
    mean = sum_emb / sum_mask
    return mean @ fc_weight.T.astype(jnp.float32) + fc_bias.astype(jnp.float32)


if __name__ == "__main__":
    # Small shapes consistent with the module's forward.
    B, S, H = 2, 8, 32
    N_TARGETS = 6
    INITIALIZER_RANGE = 0.02  # deberta-v3 config.initializer_range

    key = jax.random.PRNGKey(0)
    k_hid, k_w, k_hid2 = jax.random.split(key, 3)

    # Synthetic "last_hidden_state" standing in for the backbone output.
    last_hidden_state = jax.random.normal(k_hid, (B, S, H), dtype=jnp.float32)

    # Deterministic ragged attention mask (lengths 8 and 5).
    lengths = jnp.array([8, 5], dtype=jnp.int32)
    attention_mask = (jnp.arange(S)[None, :] < lengths[:, None]).astype(jnp.int32)

    # fc weights: normal(0, initializer_range), bias zero (matches _init_weights).
    fc_weight = INITIALIZER_RANGE * jax.random.normal(
        k_w, (N_TARGETS, H), dtype=jnp.float32)
    fc_bias = jnp.zeros((N_TARGETS,), dtype=jnp.float32)

    out = custom_model_head(last_hidden_state, attention_mask, fc_weight, fc_bias)
    out = jax.block_until_ready(out)
    ref = reference_head(last_hidden_state, attention_mask, fc_weight, fc_bias)
    assert out.shape == (B, N_TARGETS), out.shape
    assert jnp.allclose(out, ref, atol=1e-5, rtol=1e-5), (out, ref)

    # Native-dtype (bf16) path: no wrapper up-cast; the kernel casts the tile.
    hid_bf16 = last_hidden_state.astype(jnp.bfloat16)
    out_bf = jax.block_until_ready(
        custom_model_head(hid_bf16, attention_mask, fc_weight, fc_bias))
    ref_bf = reference_head(hid_bf16.astype(jnp.float32), attention_mask,
                            fc_weight, fc_bias)
    assert jnp.allclose(out_bf, ref_bf, atol=1e-3, rtol=1e-3), (out_bf, ref_bf)

    # Multi-step sequence grid: exercises the accumulator init/finalize across
    # the "arbitrary" reduction axis (grid = (1, 2)).
    B2, S2, H2 = 8, 256, 128
    hid2 = jax.random.normal(k_hid2, (B2, S2, H2), dtype=jnp.float32)
    lengths2 = (jnp.arange(B2, dtype=jnp.int32) * 29) % S2 + 1
    mask2 = (jnp.arange(S2)[None, :] < lengths2[:, None]).astype(jnp.int32)
    fc_w2 = INITIALIZER_RANGE * jax.random.normal(
        jax.random.fold_in(k_w, 1), (N_TARGETS, H2), dtype=jnp.float32)
    fc_b2 = 0.01 * jnp.arange(N_TARGETS, dtype=jnp.float32)
    out2 = jax.block_until_ready(
        custom_model_head(hid2, mask2, fc_w2, fc_b2, block_b=8, block_s=128))
    ref2 = reference_head(hid2, mask2, fc_w2, fc_b2)
    assert jnp.allclose(out2, ref2, atol=1e-4, rtol=1e-4), (out2, ref2)

    print("KERNEL_OK")
</pallas_src>

<mosaic_0001>
module attributes {stable_mosaic.version = 11 : i64} {
  func.func @_head_kernel(%arg0: i32, %arg1: i32, %arg2: memref<2x8x32xf32, #tpu.memory_space<vmem>>, %arg3: memref<2x8xi32, #tpu.memory_space<vmem>>, %arg4: memref<32x128xf32, #tpu.memory_space<vmem>>, %arg5: memref<1x128xf32, #tpu.memory_space<vmem>>, %arg6: memref<2x128xf32, #tpu.memory_space<vmem>>, %arg7: memref<2x128xf32, #tpu.memory_space<vmem>>, %arg8: memref<2x1xf32, #tpu.memory_space<vmem>>) attributes {dimension_semantics = [#tpu.dimension_semantics<parallel>, #tpu.dimension_semantics<arbitrary>], iteration_bounds = array<i64: 1, 1>, scalar_prefetch = 0 : i64, scratch_operands = 2 : i64, tpu.core_type = #tpu.core_type<tc>, window_params = [{transform_indices = @transform_0, window_bounds = array<i64: 2, 8, 32>}, {transform_indices = @transform_1, window_bounds = array<i64: 2, 8>}, {pipeline_mode = #tpu.pipeline_mode<synchronous>, transform_indices = @transform_2, window_bounds = array<i64: 32, 128>}, {pipeline_mode = #tpu.pipeline_mode<synchronous>, transform_indices = @transform_3, window_bounds = array<i64: 1, 128>}, {transform_indices = @transform_4, window_bounds = array<i64: 2, 128>}]} {
    %c0_i32 = arith.constant 0 : i32
    %0 = arith.cmpi eq, %arg1, %c0_i32 : i32
    %1 = arith.extui %0 : i1 to i32
    %c0_i32_0 = arith.constant 0 : i32
    %2 = arith.cmpi ne, %1, %c0_i32_0 : i32
    scf.if %2 {
      %cst_19 = arith.constant 0.000000e+00 : f32
      %23 = vector.broadcast %cst_19 : f32 to vector<2x128xf32>
      %c0_20 = arith.constant 0 : index
      %c0_21 = arith.constant 0 : index
      %24 = vector.load %arg7[%c0_20, %c0_21] : memref<2x128xf32, #tpu.memory_space<vmem>>, vector<2x128xf32>
      tpu.vector_store %arg7[%c0_20, %c0_21], %23 {strides = array<i32>} : memref<2x128xf32, #tpu.memory_space<vmem>>, vector<2x128xf32>,
      %cst_22 = arith.constant 0.000000e+00 : f32
      %25 = vector.broadcast %cst_22 : f32 to vector<2x1xf32>
      %c0_23 = arith.constant 0 : index
      %c0_24 = arith.constant 0 : index
      %26 = vector.load %arg8[%c0_23, %c0_24] : memref<2x1xf32, #tpu.memory_space<vmem>>, vector<2x1xf32>
      tpu.vector_store %arg8[%c0_23, %c0_24], %25 {strides = array<i32>} : memref<2x1xf32, #tpu.memory_space<vmem>>, vector<2x1xf32>,
    } else {
    }
    %c0 = arith.constant 0 : index
    %c0_1 = arith.constant 0 : index
    %c0_2 = arith.constant 0 : index
    %3 = vector.load %arg2[%c0, %c0_1, %c0_2] : memref<2x8x32xf32, #tpu.memory_space<vmem>>, vector<2x8x32xf32>
    %c0_3 = arith.constant 0 : index
    %c0_4 = arith.constant 0 : index
    %4 = vector.load %arg3[%c0_3, %c0_4] : memref<2x8xi32, #tpu.memory_space<vmem>>, vector<2x8xi32>
    %5 = arith.sitofp %4 : vector<2x8xi32> to vector<2x8xf32>
    %6 = vector.shape_cast %5 : vector<2x8xf32> to vector<2x8x1xf32>
    %7 = vector.broadcast %6 : vector<2x8x1xf32> to vector<2x8x32xf32>
    %8 = arith.mulf %3, %7 : vector<2x8x32xf32>
    %cst = arith.constant dense<0.000000e+00> : vector<2x32xf32>
    %9 = vector.multi_reduction <add>, %8, %cst [1] : vector<2x8x32xf32> to vector<2x32xf32>
    %c0_5 = arith.constant 0 : index
    %c0_6 = arith.constant 0 : index
    %10 = vector.load %arg7[%c0_5, %c0_6] : memref<2x128xf32, #tpu.memory_space<vmem>>, vector<2x128xf32>
    %c0_7 = arith.constant 0 : index
    %c0_8 = arith.constant 0 : index
    %11 = vector.load %arg4[%c0_7, %c0_8] : memref<32x128xf32, #tpu.memory_space<vmem>>, vector<32x128xf32>
    %cst_9 = arith.constant dense<0.000000e+00> : vector<2x128xf32>
    %12 = tpu.matmul %9, %11, %cst_9 {dimension_numbers = #tpu.dot_dimension_numbers<[1], [0], [0], [1], [0, 0, 1, 1], [], []>} : vector<2x32xf32>, vector<32x128xf32>, vector<2x128xf32> -> vector<2x128xf32>
    %13 = arith.addf %10, %12 : vector<2x128xf32>
    %c0_10 = arith.constant 0 : index
    %c0_11 = arith.constant 0 : index
    %14 = vector.load %arg7[%c0_10, %c0_11] : memref<2x128xf32, #tpu.memory_space<vmem>>, vector<2x128xf32>
    tpu.vector_store %arg7[%c0_10, %c0_11], %13 {strides = array<i32>} : memref<2x128xf32, #tpu.memory_space<vmem>>, vector<2x128xf32>,
    %c0_12 = arith.constant 0 : index
    %c0_13 = arith.constant 0 : index
    %15 = vector.load %arg8[%c0_12, %c0_13] : memref<2x1xf32, #tpu.memory_space<vmem>>, vector<2x1xf32>
    %cst_14 = arith.constant dense<0.000000e+00> : vector<2xf32>
    %16 = vector.multi_reduction <add>, %5, %cst_14 [1] : vector<2x8xf32> to vector<2xf32>
    %17 = vector.shape_cast %16 : vector<2xf32> to vector<2x1xf32>
    %18 = arith.addf %15, %17 : vector<2x1xf32>
    %c0_15 = arith.constant 0 : index
    %c0_16 = arith.constant 0 : index
    %19 = vector.load %arg8[%c0_15, %c0_16] : memref<2x1xf32, #tpu.memory_space<vmem>>, vector<2x1xf32>
    tpu.vector_store %arg8[%c0_15, %c0_16], %18 {strides = array<i32>} : memref<2x1xf32, #tpu.memory_space<vmem>>, vector<2x1xf32>,
    %c0_i32_17 = arith.constant 0 : i32
    %20 = arith.cmpi eq, %arg1, %c0_i32_17 : i32
    %21 = arith.extui %20 : i1 to i32
    %c0_i32_18 = arith.constant 0 : i32
    %22 = arith.cmpi ne, %21, %c0_i32_18 : i32
    scf.if %22 {
      %c0_19 = arith.constant 0 : index
      %c0_20 = arith.constant 0 : index
      %23 = vector.load %arg8[%c0_19, %c0_20] : memref<2x1xf32, #tpu.memory_space<vmem>>, vector<2x1xf32>
      %cst_21 = arith.constant 9.99999971E-10 : f32
      %24 = vector.broadcast %cst_21 : f32 to vector<2x1xf32>
      %25 = arith.maximumf %23, %24 : vector<2x1xf32>
      %c0_22 = arith.constant 0 : index
      %c0_23 = arith.constant 0 : index
      %26 = vector.load %arg7[%c0_22, %c0_23] : memref<2x128xf32, #tpu.memory_space<vmem>>, vector<2x128xf32>
      %27 = vector.broadcast %25 : vector<2x1xf32> to vector<2x128xf32>
      %28 = arith.divf %26, %27 : vector<2x128xf32>
      %c0_24 = arith.constant 0 : index
      %c0_25 = arith.constant 0 : index
      %29 = vector.load %arg5[%c0_24, %c0_25] : memref<1x128xf32, #tpu.memory_space<vmem>>, vector<1x128xf32>
      %30 = vector.broadcast %29 : vector<1x128xf32> to vector<2x128xf32>
      %31 = arith.addf %28, %30 : vector<2x128xf32>
      %c0_26 = arith.constant 0 : index
      %c0_27 = arith.constant 0 : index
      %32 = vector.load %arg6[%c0_26, %c0_27] : memref<2x128xf32, #tpu.memory_space<vmem>>, vector<2x128xf32>
      tpu.vector_store %arg6[%c0_26, %c0_27], %31 {strides = array<i32>} : memref<2x128xf32, #tpu.memory_space<vmem>>, vector<2x128xf32>,
    } else {
    }
    return
  }
  func.func @transform_0(%arg0: i32, %arg1: i32) -> (i32, i32, i32) {
    %c0_i32 = arith.constant 0 : i32
    %c0_i32_0 = arith.constant 0 : i32
    return %arg0, %arg1, %c0_i32 : i32, i32, i32
  }
  func.func @transform_1(%arg0: i32, %arg1: i32) -> (i32, i32) {
    %c0_i32 = arith.constant 0 : i32
    return %arg0, %arg1 : i32, i32
  }
  func.func @transform_2(%arg0: i32, %arg1: i32) -> (i32, i32) {
    %c0_i32 = arith.constant 0 : i32
    %c0_i32_0 = arith.constant 0 : i32
    %c0_i32_1 = arith.constant 0 : i32
    return %c0_i32, %c0_i32_0 : i32, i32
  }
  func.func @transform_3(%arg0: i32, %arg1: i32) -> (i32, i32) {
    %c0_i32 = arith.constant 0 : i32
    %c0_i32_0 = arith.constant 0 : i32
    %c0_i32_1 = arith.constant 0 : i32
    return %c0_i32, %c0_i32_0 : i32, i32
  }
  func.func @transform_4(%arg0: i32, %arg1: i32) -> (i32, i32) {
    %c0_i32 = arith.constant 0 : i32
    %c0_i32_0 = arith.constant 0 : i32
    return %arg0, %c0_i32 : i32, i32
  }
}

</mosaic_0001>

<bundles_post_ra>
// kernel: tpu_custom_call.1
= control target key start
LH: loop header
LB: loop body
LE: loop exit
PB: predicated region body
PF: predicated region fallthrough
CT: control target
= control target key end

     0   :  { %9 = vsyncpa [#allocation5], 0  ;;  %s407_s0 = inlined_call_operand.hbm [shape: f32[2,8,32], index: 0, kind: input, shape index: {}]   ;;  %s408_s1 = inlined_call_operand.vmem [shape: s32[2,8], index: 1, kind: input, shape index: {}]   ;;  %s409_s2 = inlined_call_operand.hbm [shape: f32[32,128], index: 2, kind: input, shape index: {}]   ;;  %s410_s3 = inlined_call_operand.vmem [shape: f32[1,128], index: 3, kind: input, shape index: {}]   ;;  %s411_s4 = inlined_call_operand.hbm [shape: f32[2,128], index: 4, kind: output, shape index: {}]  }
   0x1   :  { %10 = vsyncpa [#allocation8], 0 }
   0x2   :  { %11 = vsyncpa [#allocation6], 0  ;;  %s326_s15 = smov [#allocation4]   ;;  %s254_s19 = scalar_lea.hbm %s407_s0, 256 }
   0x3   :  { %s17_s16 = sshll.u32 %s326_s15, 4  ;;  %p255_p0 = scmp.ne.s32.totalorder %s407_s0, %s254_s19  ;;  %s18_s16 = int_to_ptr.vmem [resolvable:$true] %s17_s16 }
   0x4   :  { %p258_p1 = scmp.lt.u32.totalorder %s254_s19, %s407_s0 }
   0x6   :  { %p260_p2 = pnand %p258_p1, %p255_p0 }
   0x8   :  { %263 = shalt.err (!%p260_p2)
}
   0x9   :  { %s264_s24 = scalar_lea.vmem %s18_s16, 256  ;;  %p269_p4 = scmp.lt.s32.totalorder %s18_s16, %s18_s16 }
   0xa   :  { %p265_p3 = scmp.ne.s32.totalorder %s18_s16, %s264_s24  ;;  %p270_p5 = scmp.lt.s32.totalorder %s264_s24, %s264_s24 }
   0xc   :  { %p271_p6 = por %p270_p5, %p269_p4 }
   0xe   :  { %p272_p7 = pnand %p271_p6, %p265_p3 }
  0x10   :  { %275 = shalt.err (!%p272_p7)
}
  0x11   :  { %s327_s25 = smov 128   ;;  %s328_s26 = smov 8  }
  0x12   :  { %23 = dma.hbm_to_vmem [thread:$0]  %s407_s0, 256, %s18_s16, [#allocation5], %s327_s25, %s327_s25, %s328_s26  }
  0x13   :  { %s329_s29 = smov [#allocation7]   ;;  %s276_s7 = scalar_lea.hbm %s409_s2, 512 }
  0x14   :  { %s31_s30 = sshll.u32 %s329_s29, 4  ;;  %p277_p8 = scmp.ne.s32.totalorder %s409_s2, %s276_s7  ;;  %s32_s30 = int_to_ptr.vmem [resolvable:$true] %s31_s30 }
  0x15   :  { %p280_p9 = scmp.lt.u32.totalorder %s276_s7, %s409_s2 }
  0x17   :  { %p282_p10 = pnand %p280_p9, %p277_p8 }
  0x19   :  { %285 = shalt.err (!%p282_p10)
}
  0x1a   :  { %s286_s12 = scalar_lea.vmem %s32_s30, 512  ;;  %p291_p12 = scmp.lt.s32.totalorder %s32_s30, %s32_s30 }
  0x1b   :  { %p287_p11 = scmp.ne.s32.totalorder %s32_s30, %s286_s12  ;;  %p292_p13 = scmp.lt.s32.totalorder %s286_s12, %s286_s12 }
  0x1d   :  { %p293_p0 = por %p292_p13, %p291_p12 }
  0x1f   :  { %p294_p1 = pnand %p293_p0, %p287_p11 }
  0x21   :  { %297 = shalt.err (!%p294_p1)
}
  0x22   :  { %37 = dma.hbm_to_vmem [thread:$0]  %s409_s2, 512, %s32_s30, [#allocation8], %s327_s25, %s327_s25, %s328_s26  }
  0x23   :  { %320 = dma.done.wait [#allocation5], 256  }
  0x24   :  { %321 = vsyncadd [#allocation5], 4294967040 }
  0x25   :  { %322 = dma.done.wait [#allocation8], 512  }
  0x26   :  { %323 = vsyncadd [#allocation8], 4294966784  ;;  %v57_v0 = vlaneseq  ;;  %v55_v3 = vld [vmem:[%s408_s1] sm:$0x3]  ;;  %vm172_vm0 = vcmask 58368   ;;  %v89_v6 = vld [vmem:[#allocation7] sm:$0xff] }
  0x27   :  { %v56_v4 = vcvt.s32.f32 %v55_v3  ;;  %v90_v7 = vld [vmem:[#allocation7 + $0x8] sm:$0xff]  ;;  %v330_v10 = vmov 0.0|0.0   ;;  %v91_v13 = vld [vmem:[#allocation7 + $0x10] sm:$0xff]  ;;  %v92_v14 = vld [vmem:[#allocation7 + $0x18] sm:$0xff]  ;;  %vm51_vm1 = vcmask 1024   ;;  %v331_v16 = vmov 0.0  }
  0x28   :  { %v58_v1 = vshrl.u32 %v57_v0, 7  ;;  %235 = vmatprep.subr.bf16.mxu0 %v330_v10  ;;  %v236_v11 = vpack.c.bf16 %v90_v7, %v89_v6  ;;  %v239_v15 = vpack.c.bf16 %v92_v14, %v91_v13  ;;  %50 = vst [vmem:[#allocation2] sm:$0x3] %v331_v16  ;;  %52 = vst.msk [vmem:[#allocation3] sm:$0x3] %vm51_vm1, %v331_v16  ;;  %vm332_vm2 = vmmov 0  }
  0x29   :  { %v173_v9 = vsel %vm172_vm0, %v56_v4, 0.0  ;;  %232 = vmatprep.mubr.msk.f32.mxu0 %vm332_vm2, %v331_v16  ;;  %v333_v17 = vmov 0   ;;  %v53_v18 = vld [vmem:[#allocation4] sm:$0xff]  ;;  %vm73_vm3 = vcmask 261120   ;;  %v54_v21 = vld [vmem:[#allocation4 + $0x8] sm:$0xff]  ;;  %vm95_vm4 = vcmask 1041409  }
  0x2a   :  { %v59_v2 = vsub.s32 0, %v58_v1  ;;  %v66_v5 = vsub.s32 1, %v58_v1  ;;  %174 = vadd.xlane.f32.xlu1 %v173_v9  ;;  %237 = vmatpush3.bf16.msra.mxu0 %v236_v11  ;;  %v218_v51 = vld [vmem:[%s410_s3] ss:$0 sm:$0xff]  ;;  %s334_s16 = smov [#allocation9]  }
  0x2b   :  { %238 = vmatprep.subr.bf16.mxu0 %v330_v10  ;;  %250 = vset.pattern.permute.xlu1 %v333_v17  ;;  %s207_s17 = sshll.u32 %s334_s16, 4  ;;  %s208_s17 = int_to_ptr.vmem [resolvable:$true] %s207_s17 }
  0x2c   :  { %v60_v8 = vrot.slane %v56_v4, %v59_v2  ;;  %v67_v12 = vrot.slane %v56_v4, %v66_v5  ;;  %251 = vset.pattern.permute.xlu0 %v333_v17  ;;  %s298_s18 = scalar_lea.vmem %s208_s17, 32  ;;  %p303_p3 = scmp.lt.s32.totalorder %s208_s17, %s208_s17 }
  0x2d   :  { %p299_p2 = scmp.ne.s32.totalorder %s208_s17, %s298_s18  ;;  %p304_p4 = scmp.lt.s32.totalorder %s298_s18, %s298_s18 }
  0x2e   :  { %62 = vbcast.lane.b32.xlu0 %v60_v8, 256  ;;  %240 = vmatpush3.bf16.msra.mxu0 %v239_v15 }
  0x2f   :  { %v171_v39 = vld [vmem:[#allocation3] sm:$0x3]  ;;  %v88_v45 = vld [vmem:[#allocation2] sm:$0x3]  ;;  %p305_p5 = por %p304_p4, %p303_p3 }
  0x31   :  { %p306_p6 = pnand %p305_p5, %p299_p2 }
  0x32   :  { %69 = vbcast.lane.b32.xlu0 %v67_v12, 256 }
  0xa0   :  { %v63_v19 = vpop.permute.xlu0 %62 }
  0xa1   :  { %v71_v20 = vmul.f32 %v63_v19, %v53_v18 }
  0xa3   :  { %v74_v22 = vsel %vm73_vm3, %v71_v20, 0.0 }
  0xa4   :  { %v75_v23 = vrot.slane %v74_v22, 4  ;;  %v70_v24 = vpop.permute.xlu0 %69 }
  0xa5   :  { %v72_v25 = vmul.f32 %v70_v24, %v54_v21 }
  0xa6   :  { %v76_v26 = vadd.f32 %v75_v23, %v74_v22 }
  0xa7   :  { %v81_v27 = vsel %vm73_vm3, %v72_v25, 0.0 }
  0xa8   :  { %v77_v28 = vrot.slane %v76_v26, 2  ;;  %v82_v29 = vrot.slane %v81_v27, 4 }
  0xaa   :  { %v78_v30 = vadd.f32 %v77_v28, %v76_v26  ;;  %v83_v31 = vadd.f32 %v82_v29, %v81_v27 }
  0xac   :  { %v84_v32 = vrot.slane %v83_v31, 2  ;;  %v79_v33 = vrot.slane %v78_v30, 1 }
  0xae   :  { %v85_v34 = vadd.f32 %v84_v32, %v83_v31  ;;  %v80_v36 = vadd.f32 %v79_v33, %v78_v30 }
  0xb0   :  { %v86_v35 = vrot.slane %v85_v34, 1 }
  0xb2   :  { %v87_v37 = vadd.f32 %v86_v35, %v85_v34 }
  0xb4   :  { %v96_v38 = vsel %vm95_vm4, %v87_v37, %v80_v36 }
  0xb5   :  { %233 = vmatmul.mubr.msk.f32.vlgmr.msra.gmra.mrb[0].mxu0 %vm73_vm3, %v96_v38 }
  0xb7   :  { %v175_v40 = vpop.xlane.xlu1 %174 }
  0xb8   :  { %v176_v41 = vadd.f32 %v175_v40, %v171_v39 }
  0xba   :  { %178 = vst.msk [vmem:[#allocation3] sm:$0x3] %vm51_vm1, %v176_v41 }
  0xc1   :  { %v182_v42 = vld [vmem:[#allocation3] sm:$0x3] }
  0xc2   :  { %v183_v43 = vmax.f32 %v182_v42, 1e-09 }
  0xc4   :  { %187 = vperm.xlu1 %250, %v183_v43  }
 0x143   :  { %v188_v44 = vpop.permute.xlu1 %187 }
 0x144   :  { %252 = vrcp.f32 %v188_v44 }
 0x14e   :  { %v253_v49 = vpop.eup %252 }
 0x188   :  { %v165_v46 = vpop.f32.mrb[0].mxu0 }
 0x189   :  { %v169_v47 = vadd.f32 %v165_v46, %v88_v45  ;;  %v234_v48 = vpop.f32.mrb[1].mxu0 }
 0x18b   :  { %170 = vst [vmem:[#allocation2] sm:$0x3] %v169_v47 }
 0x192   :  { %v184_v50 = vld [vmem:[#allocation2] sm:$0x3] }
 0x193   :  { %v191_v52 = vmul.f32 %v253_v49, %v184_v50 }
 0x195   :  { %v199_v53 = vadd.f32 %v218_v51, %v191_v52 }
 0x197   :  { %200 = vst [vmem:[#allocation9] sm:$0x3] %v199_v53 }
 0x198   :  { %309 = shalt.err (!%p306_p6)
}
 0x199   :  { %s310_s21 = scalar_lea.hbm %s411_s4, 32 }
 0x19a   :  { %p311_p7 = scmp.ne.s32.totalorder %s411_s4, %s310_s21  ;;  %p314_p8 = scmp.lt.u32.totalorder %s310_s21, %s411_s4 }
 0x19c   :  { %p316_p9 = pnand %p314_p8, %p311_p7 }
 0x19e   :  { %319 = shalt.err (!%p316_p9)
}
 0x19f   :  { %210 = dma.vmem_to_hbm [thread:$0]  %s208_s17, 32, %s411_s4, [#allocation6]  }
 0x1a0   :  { %324 = dma.done.wait [#allocation6], 32  }
 0x1a1   :  { %325 = vsyncadd [#allocation6], 4294967264 }
 0x1a2   :  { %214 = vsyncpa [#allocation5], 1 }
 0x1a3   :  { %215 = vsyncpa [#allocation8], 1 }
 0x1a4   :  { %216 = vsyncpa [#allocation6], 1 }

</bundles_post_ra>
